<compile_context>
chip_gen: v7x
topology: tpu7x:2x2x1
jax: 0.10.0
libtpu: 0.0.40
codegen_flags: <defaults>
</compile_context>

<pallas_src>
import jax
import jax.numpy as jnp
from jax.experimental import pallas as pl
from jax.experimental.pallas import tpu as pltpu

UPSAMPLE = 4  # ConvTranspose2d kernel_size == stride == 4


def _constants(h: int, w: int, p: int):
    """Builds C=[A|R] (Hu,2H) and block-diagonal E_bd, B_bd ((P*W, P*Wu)) in f32."""
    hu, wu = UPSAMPLE * h, UPSAMPLE * w

    # R[I, i] = 1 iff I // 4 == i     (row replication, left-multiply)
    R = (jnp.arange(hu)[:, None] // UPSAMPLE == jnp.arange(h)[None, :]).astype(jnp.float32)
    # E[j, J] = 1 iff J // 4 == j     (column replication, right-multiply)
    E = (jnp.arange(wu)[None, :] // UPSAMPLE == jnp.arange(w)[:, None]).astype(jnp.float32)

    def tridiag(n):
        d = jnp.arange(n)[:, None] - jnp.arange(n)[None, :]
        return jnp.where(d == 0, 5.0, jnp.where(jnp.abs(d) == 1, -1.0, 0.0)).astype(jnp.float32)

    A = (tridiag(hu) @ R) / 6.0        # (Hu, H)  row filter folded into upsample, 1/6 baked in
    B = (E @ tridiag(wu)) / 6.0        # (W, Wu)  col filter folded into upsample, 1/6 baked in
    C = jnp.concatenate([A, R], axis=1)  # (Hu, 2H) fused row constant

    # Block-diagonal replication over the P planes packed along lanes.
    eye = jnp.eye(p, dtype=jnp.float32)
    E_bd = jnp.einsum("pq,wv->pwqv", eye, E).reshape(p * w, p * wu)
    B_bd = jnp.einsum("pq,wv->pwqv", eye, B).reshape(p * w, p * wu)
    return C, E_bd, B_bd


def _cheap_model_kernel(c_ref, e_ref, b_ref, x_ref, o_ref):
    """x_ref: (H, P*W) planes packed along lanes -> o_ref: (Hu, P*Wu), lane-dense."""
    x = x_ref[...]                                                          # (H, P*W)
    ze = jnp.dot(x, e_ref[...], preferred_element_type=jnp.float32)        # (H, P*Wu)
    zb = jnp.dot(x, b_ref[...], preferred_element_type=jnp.float32)        # (H, P*Wu)
    z = jnp.concatenate([ze, zb], axis=0)                                   # (2H, P*Wu)
    y = jnp.dot(c_ref[...], z, preferred_element_type=jnp.float32)         # (Hu, P*Wu)
    o_ref[...] = y.astype(o_ref.dtype)                                      # one full-block store


def _planes_per_block(nc: int, h: int, w: int, vmem_budget_bytes: int = 12 << 20) -> int:
    """Planes per grid step. Prefers a single step; includes constants in the estimate."""
    hu, wu = UPSAMPLE * h, UPSAMPLE * w

    def est_bytes(p):
        const = 2 * (p * w) * (p * wu) * 4 + hu * (2 * h) * 4       # E_bd, B_bd, C (resident)
        blocks = 2 * (h * p * w) * 4 + 2 * (hu * p * wu) * 4        # double-buffered in/out
        temps = 4 * h * (p * wu) * 4                                # ze, zb, vstack
        return const + blocks + temps

    if est_bytes(nc) <= vmem_budget_bytes:
        return nc  # single grid step (the shipped case)
    for p in range(nc - 1, 0, -1):
        if nc % p:
            continue
        # With >1 grid step the lane dims of the x / out blocks must be 128-aligned.
        if (p * w) % 128 or (p * wu) % 128:
            continue
        if est_bytes(p) <= vmem_budget_bytes:
            return p
    return nc  # fall back to one big step (raise vmem_limit_bytes when scaling up)


@jax.jit
def cheap_model(x: jnp.ndarray) -> jnp.ndarray:
    """x: (N, 3, H, W) float32 (NCHW, like PyTorch). Returns (N, 3, 4H, 4W)."""
    n, c, h, w = x.shape
    hu, wu = UPSAMPLE * h, UPSAMPLE * w
    nc = n * c
    p = _planes_per_block(nc, h, w)
    grid = nc // p

    C, E_bd, B_bd = _constants(h, w, p)

    # Pack planes along lanes: (H, nc*W), plane q occupies columns [q*W, (q+1)*W).
    x_wide = x.reshape(nc, h, w).transpose(1, 0, 2).reshape(h, nc * w)

    out = pl.pallas_call(
        _cheap_model_kernel,
        out_shape=jax.ShapeDtypeStruct((hu, nc * wu), x.dtype),
        grid=(grid,),
        in_specs=[
            pl.BlockSpec((hu, 2 * h), lambda i: (0, 0)),          # C    (resident constant)
            pl.BlockSpec((p * w, p * wu), lambda i: (0, 0)),      # E_bd (resident constant)
            pl.BlockSpec((p * w, p * wu), lambda i: (0, 0)),      # B_bd (resident constant)
            pl.BlockSpec((h, p * w), lambda i: (0, i)),           # x, plane group i
        ],
        out_specs=pl.BlockSpec((hu, p * wu), lambda i: (0, i)),   # lane-dense output block
        compiler_params=pltpu.CompilerParams(
            dimension_semantics=("arbitrary",),
        ),
    )(C, E_bd, B_bd, x_wide)

    # (Hu, nc*Wu) -> (nc, Hu, Wu) -> (N, C, Hu, Wu); tiny wrapper-side transpose (~24 KiB).
    return out.reshape(hu, nc, wu).transpose(1, 0, 2).reshape(n, c, hu, wu)


def _reference(x: jnp.ndarray) -> jnp.ndarray:
    """Pure-JAX reference (matches the PyTorch module semantics)."""
    up = jnp.repeat(jnp.repeat(x, UPSAMPLE, axis=2), UPSAMPLE, axis=3)
    pd = jnp.pad(up, ((0, 0), (0, 0), (1, 1), (1, 1)))
    y = (
        10.0 * pd[:, :, 1:-1, 1:-1]
        - pd[:, :, :-2, 1:-1]
        - pd[:, :, 2:, 1:-1]
        - pd[:, :, 1:-1, :-2]
        - pd[:, :, 1:-1, 2:]
    ) / 6.0
    return y


if __name__ == "__main__":
    key = jax.random.PRNGKey(0)
    # Module fixes channels = 3; small batch / spatial.
    x = jax.random.normal(key, (2, 3, 8, 8), dtype=jnp.float32)

    y = cheap_model(x)
    y = jax.block_until_ready(y)

    y_ref = _reference(x)
    assert y.shape == (2, 3, 32, 32), y.shape
    assert jnp.allclose(y, y_ref, atol=1e-5, rtol=1e-5), (
        float(jnp.max(jnp.abs(y - y_ref)))
    )

    print("KERNEL_OK")
</pallas_src>

<mosaic_0001>
module attributes {stable_mosaic.version = 11 : i64} {
  func.func @_cheap_model_kernel(%arg0: i32, %arg1: memref<32x16xf32, #tpu.memory_space<vmem>>, %arg2: memref<48x192xf32, #tpu.memory_space<vmem>>, %arg3: memref<48x192xf32, #tpu.memory_space<vmem>>, %arg4: memref<8x48xf32, #tpu.memory_space<vmem>>, %arg5: memref<32x192xf32, #tpu.memory_space<vmem>>) attributes {dimension_semantics = [#tpu.dimension_semantics<arbitrary>], iteration_bounds = array<i64: 1>, scalar_prefetch = 0 : i64, scratch_operands = 0 : i64, tpu.core_type = #tpu.core_type<tc>, window_params = [{pipeline_mode = #tpu.pipeline_mode<synchronous>, transform_indices = @transform_0, window_bounds = array<i64: 32, 16>}, {pipeline_mode = #tpu.pipeline_mode<synchronous>, transform_indices = @transform_1, window_bounds = array<i64: 48, 192>}, {pipeline_mode = #tpu.pipeline_mode<synchronous>, transform_indices = @transform_2, window_bounds = array<i64: 48, 192>}, {transform_indices = @transform_3, window_bounds = array<i64: 8, 48>}, {transform_indices = @transform_4, window_bounds = array<i64: 32, 192>}]} {
    %c0 = arith.constant 0 : index
    %c0_0 = arith.constant 0 : index
    %0 = vector.load %arg4[%c0, %c0_0] : memref<8x48xf32, #tpu.memory_space<vmem>>, vector<8x48xf32>
    %c0_1 = arith.constant 0 : index
    %c0_2 = arith.constant 0 : index
    %1 = vector.load %arg2[%c0_1, %c0_2] : memref<48x192xf32, #tpu.memory_space<vmem>>, vector<48x192xf32>
    %cst = arith.constant dense<0.000000e+00> : vector<8x192xf32>
    %2 = tpu.matmul %0, %1, %cst {dimension_numbers = #tpu.dot_dimension_numbers<[1], [0], [0], [1], [0, 0, 1, 1], [], []>} : vector<8x48xf32>, vector<48x192xf32>, vector<8x192xf32> -> vector<8x192xf32>
    %c0_3 = arith.constant 0 : index
    %c0_4 = arith.constant 0 : index
    %3 = vector.load %arg3[%c0_3, %c0_4] : memref<48x192xf32, #tpu.memory_space<vmem>>, vector<48x192xf32>
    %cst_5 = arith.constant dense<0.000000e+00> : vector<8x192xf32>
    %4 = tpu.matmul %0, %3, %cst_5 {dimension_numbers = #tpu.dot_dimension_numbers<[1], [0], [0], [1], [0, 0, 1, 1], [], []>} : vector<8x48xf32>, vector<48x192xf32>, vector<8x192xf32> -> vector<8x192xf32>
    %5 = tpu.concatenate %2, %4 in 0 : vector<8x192xf32>, vector<8x192xf32> -> vector<16x192xf32>
    %c0_6 = arith.constant 0 : index
    %c0_7 = arith.constant 0 : index
    %6 = vector.load %arg1[%c0_6, %c0_7] : memref<32x16xf32, #tpu.memory_space<vmem>>, vector<32x16xf32>
    %cst_8 = arith.constant dense<0.000000e+00> : vector<32x192xf32>
    %7 = tpu.matmul %6, %5, %cst_8 {dimension_numbers = #tpu.dot_dimension_numbers<[1], [0], [0], [1], [0, 0, 1, 1], [], []>} : vector<32x16xf32>, vector<16x192xf32>, vector<32x192xf32> -> vector<32x192xf32>
    %c0_9 = arith.constant 0 : index
    %c0_10 = arith.constant 0 : index
    %8 = vector.load %arg5[%c0_9, %c0_10] : memref<32x192xf32, #tpu.memory_space<vmem>>, vector<32x192xf32>
    tpu.vector_store %arg5[%c0_9, %c0_10], %7 {strides = array<i32>} : memref<32x192xf32, #tpu.memory_space<vmem>>, vector<32x192xf32>,
    return
  }
  func.func @transform_0(%arg0: i32) -> (i32, i32) {
    %c0_i32 = arith.constant 0 : i32
    %c0_i32_0 = arith.constant 0 : i32
    %c0_i32_1 = arith.constant 0 : i32
    return %c0_i32, %c0_i32_0 : i32, i32
  }
  func.func @transform_1(%arg0: i32) -> (i32, i32) {
    %c0_i32 = arith.constant 0 : i32
    %c0_i32_0 = arith.constant 0 : i32
    %c0_i32_1 = arith.constant 0 : i32
    return %c0_i32, %c0_i32_0 : i32, i32
  }
  func.func @transform_2(%arg0: i32) -> (i32, i32) {
    %c0_i32 = arith.constant 0 : i32
    %c0_i32_0 = arith.constant 0 : i32
    %c0_i32_1 = arith.constant 0 : i32
    return %c0_i32, %c0_i32_0 : i32, i32
  }
  func.func @transform_3(%arg0: i32) -> (i32, i32) {
    %c0_i32 = arith.constant 0 : i32
    %c0_i32_0 = arith.constant 0 : i32
    return %c0_i32, %arg0 : i32, i32
  }
  func.func @transform_4(%arg0: i32) -> (i32, i32) {
    %c0_i32 = arith.constant 0 : i32
    %c0_i32_0 = arith.constant 0 : i32
    return %c0_i32, %arg0 : i32, i32
  }
}

</mosaic_0001>

<bundles_post_ra>
// kernel: cheap_model.1
= control target key start
LH: loop header
LB: loop body
LE: loop exit
PB: predicated region body
PF: predicated region fallthrough
CT: control target
= control target key end

     0   :  { %v344_v3 = vmov 0.0   ;;  %vm30_vm0 = vcmask 392192   ;;  %vm192_vm1 = vcmask 130048   ;;  %vm295_vm2 = vcmask 523264   ;;  %s491_s1 = inlined_call_operand.vmem [shape: f32[48,192], index: 1, kind: input, shape index: {}]   ;;  %s492_s2 = inlined_call_operand.vmem [shape: f32[48,192], index: 2, kind: input, shape index: {}]   ;;  %s493_s3 = inlined_call_operand.vmem [shape: f32[8,48], index: 3, kind: input, shape index: {}]   ;;  %s494_s0 = inlined_call_operand.vmem [shape: f32[32,16], index: 0, kind: input, shape index: {}]   ;;  %s495_s4 = inlined_call_operand.vmem [shape: f32[32,192], index: 4, kind: output, shape index: {}]  }
   0x1   :  { %v19_v0 = vld [vmem:[%s491_s1 + $0x8] sm:$0xff]  ;;  %v21_v1 = vld [vmem:[%s491_s1 + $0x18] sm:$0xff]  ;;  %98 = vmatprep.mubr.f32.mxu0 %v344_v3  ;;  %181 = vmatprep.mubr.f32.mxu1 %v344_v3  ;;  %v18_v6 = vld [vmem:[%s491_s1] sm:$0xff] }
   0x2   :  { %v106_v2 = vld [vmem:[%s492_s2 + $0x8] sm:$0xff]  ;;  %v313_v4 = vpack.c.bf16 %v21_v1, %v19_v0  ;;  %v108_v5 = vld [vmem:[%s492_s2 + $0x18] sm:$0xff]  ;;  %v20_v7 = vld [vmem:[%s491_s1 + $0x10] sm:$0xff] }
   0x3   :  { %v325_v8 = vpack.c.bf16 %v108_v5, %v106_v2  ;;  %v315_v9 = vpack.c.bf16 %v20_v7, %v18_v6  ;;  %v105_v10 = vld [vmem:[%s492_s2] sm:$0xff]  ;;  %v107_v11 = vld [vmem:[%s492_s2 + $0x10] sm:$0xff]  ;;  %v23_v12 = vld [vmem:[%s491_s1 + $0x28] sm:$0xff] }
   0x4   :  { %314 = vmatprep.subr.bf16.mxu0 %v313_v4  ;;  %v327_v13 = vpack.c.bf16 %v107_v11, %v105_v10  ;;  %v25_v14 = vld [vmem:[%s491_s1 + $0x38] sm:$0xff]  ;;  %v110_v15 = vld [vmem:[%s492_s2 + $0x28] sm:$0xff]  ;;  %v22_v19 = vld [vmem:[%s491_s1 + $0x20] sm:$0xff] }
   0x5   :  { %v112_v16 = vld [vmem:[%s492_s2 + $0x38] sm:$0xff]  ;;  %326 = vmatprep.subr.bf16.mxu1 %v325_v8  ;;  %316 = vmatpush1.bf16.msra.mxu0 %v315_v9  ;;  %v317_v17 = vpack.c.bf16 %v25_v14, %v23_v12  ;;  %v24_v20 = vld [vmem:[%s491_s1 + $0x30] sm:$0xff]  ;;  %v109_v21 = vld [vmem:[%s492_s2 + $0x20] sm:$0xff] }
   0x6   :  { %v329_v18 = vpack.c.bf16 %v112_v16, %v110_v15  ;;  %328 = vmatpush1.bf16.msra.mxu1 %v327_v13  ;;  %v319_v22 = vpack.c.bf16 %v24_v20, %v22_v19  ;;  %v111_v23 = vld [vmem:[%s492_s2 + $0x30] sm:$0xff]  ;;  %v27_v24 = vld [vmem:[%s491_s1 + $0x48] sm:$0xff]  ;;  %v29_v25 = vld [vmem:[%s491_s1 + $0x58] sm:$0xff] }
   0x7   :  { %318 = vmatprep.subr.bf16.mxu0 %v317_v17  ;;  %v331_v26 = vpack.c.bf16 %v111_v23, %v109_v21  ;;  %v321_v27 = vpack.c.bf16 %v29_v25, %v27_v24  ;;  %v114_v28 = vld [vmem:[%s492_s2 + $0x48] sm:$0xff]  ;;  %v116_v29 = vld [vmem:[%s492_s2 + $0x58] sm:$0xff]  ;;  %v26_v30 = vld [vmem:[%s491_s1 + $0x40] sm:$0xff] }
   0x8   :  { %330 = vmatprep.subr.bf16.mxu1 %v329_v18  ;;  %v333_v31 = vpack.c.bf16 %v116_v29, %v114_v28  ;;  %v28_v32 = vld [vmem:[%s491_s1 + $0x50] sm:$0xff]  ;;  %v113_v33 = vld [vmem:[%s492_s2 + $0x40] sm:$0xff]  ;;  %v189_v46 = vld [vmem:[%s494_s0 + $0x8] sm:$0xff] }
   0x9   :  { %v115_v34 = vld [vmem:[%s492_s2 + $0x50] sm:$0xff]  ;;  %320 = vmatpush1.bf16.msra.mxu0 %v319_v22  ;;  %v323_v35 = vpack.c.bf16 %v28_v32, %v26_v30  ;;  %v17_v37 = vld [vmem:[%s493_s3] sm:$0xff]  ;;  %v191_v47 = vld [vmem:[%s494_s0 + $0x18] sm:$0xff] }
   0xa   :  { %332 = vmatpush1.bf16.msra.mxu1 %v331_v26  ;;  %322 = vmatprep.subr.bf16.mxu0 %v321_v27  ;;  %v335_v36 = vpack.c.bf16 %v115_v34, %v113_v33  ;;  %v188_v44 = vld [vmem:[%s494_s0] sm:$0xff]  ;;  %v190_v45 = vld [vmem:[%s494_s0 + $0x10] sm:$0xff] }
   0xb   :  { %334 = vmatprep.subr.bf16.mxu1 %v333_v31 }
   0xd   :  { %324 = vmatpush1.bf16.msra.mxu0 %v323_v35 }
   0xe   :  { %336 = vmatpush1.bf16.msra.mxu1 %v335_v36 }
  0x10   :  { %307 = vmatmul.mubr.msk.f32.vlgmr.msra.gmra.mrb[0].mxu0 %vm30_vm0, %v17_v37 }
  0x11   :  { %308 = vmatmul.mubr.msk.f32.vlgmr.msra.gmra.mrb[0].mxu1 %vm30_vm0, %v17_v37  ;;  %269 = vmatprep.mubr.f32.mxu0 %v344_v3 }
  0x12   :  { %281 = vmatprep.mubr.f32.mxu1 %v344_v3 }
  0xe3   :  { %v100_v38 = vpop.f32.mrb[0].mxu0 }
  0xe4   :  { %v183_v39 = vpop.f32.mrb[0].mxu1  ;;  %v102_v40 = vpop.f32.mrb[1].mxu0 }
  0xe5   :  { %v339_v41 = vpack.c.bf16 %v183_v39, %v100_v38  ;;  %v185_v42 = vpop.f32.mrb[1].mxu1 }
  0xe6   :  { %v337_v43 = vpack.c.bf16 %v185_v42, %v102_v40 }
  0xe8   :  { %338 = vmatprep.subr.bf16.mxu0 %v337_v43  ;;  %341 = vmatprep.subr.bf16.mxu1 %v337_v43 }
  0xe9   :  { %340 = vmatpush1.bf16.msra.mxu0 %v339_v41  ;;  %342 = vmatpush1.bf16.msra.mxu1 %v339_v41 }
  0xec   :  { %309 = vmatmul.mubr.msk.f32.vlgmr.msra.gmra.mrb[2].mxu0 %vm192_vm1, %v188_v44  ;;  %311 = vmatmul.mubr.msk.f32.vlgmr.msra.gmra.mrb[2].mxu1 %vm192_vm1, %v190_v45 }
  0xed   :  { %275 = vmatprep.mubr.f32.mxu0 %v344_v3  ;;  %287 = vmatprep.mubr.f32.mxu1 %v344_v3 }
  0xf0   :  { %310 = vmatmul.mubr.msk.f32.gmra.mrb[4].mxu0 %vm192_vm1, %v189_v46  ;;  %312 = vmatmul.mubr.msk.f32.gmra.mrb[4].mxu1 %vm192_vm1, %v191_v47 }
 0x1bf   :  { %v271_v48 = vpop.f32.mrb[2].mxu0  ;;  %v283_v49 = vpop.f32.mrb[2].mxu1 }
 0x1c0   :  { %294 = vst [vmem:[%s495_s4] sm:$0xff] %v271_v48  ;;  %299 = vst [vmem:[%s495_s4 + $0x20] sm:$0xff] %v283_v49  ;;  %v273_v50 = vpop.f32.mrb[3].mxu0  ;;  %v285_v51 = vpop.f32.mrb[3].mxu1 }
 0x1c1   :  { %296 = vst.msk [vmem:[%s495_s4 + $0x8] sm:$0xff] %vm295_vm2, %v273_v50  ;;  %300 = vst.msk [vmem:[%s495_s4 + $0x28] sm:$0xff] %vm295_vm2, %v285_v51 }
 0x1c3   :  { %v277_v52 = vpop.f32.mrb[4].mxu0  ;;  %v289_v53 = vpop.f32.mrb[4].mxu1 }
 0x1c4   :  { %297 = vst [vmem:[%s495_s4 + $0x10] sm:$0xff] %v277_v52  ;;  %301 = vst [vmem:[%s495_s4 + $0x30] sm:$0xff] %v289_v53  ;;  %v279_v54 = vpop.f32.mrb[5].mxu0  ;;  %v291_v55 = vpop.f32.mrb[5].mxu1 }
 0x1c5   :  { %298 = vst.msk [vmem:[%s495_s4 + $0x18] sm:$0xff] %vm295_vm2, %v279_v54  ;;  %302 = vst.msk [vmem:[%s495_s4 + $0x38] sm:$0xff] %vm295_vm2, %v291_v55 }

</bundles_post_ra>
